<compile_context>
chip_gen: v7x
topology: tpu7x:2x2x1
jax: 0.10.0
libtpu: 0.0.40
codegen_flags: <defaults>
</compile_context>

<pallas_src>
import jax
import jax.numpy as jnp
from jax.experimental import pallas as pl
from jax.experimental.pallas import tpu as pltpu

EPS = 1e-5
LANE = 128


# ----------------------------------------------------------------------------
# helpers
# ----------------------------------------------------------------------------
def _round_up(v, m):
    return (v + m - 1) // m * m


def _pad_axis(a, target, axis):
    pad = target - a.shape[axis]
    if pad <= 0:
        return a
    widths = [(0, 0)] * a.ndim
    widths[axis] = (0, pad)
    return jnp.pad(a, widths)  # zero padding


def _bn_train(h, inv_n, gamma=None, beta=None):
    """Training-mode BatchNorm1d: one reduction pass + fused scale/shift.

    h: (N, F) float32. Stats over the batch axis, biased variance.
    """
    s1 = jnp.sum(h, axis=0, keepdims=True)
    s2 = jnp.sum(h * h, axis=0, keepdims=True)
    mean = s1 * inv_n
    var = jnp.maximum(s2 * inv_n - mean * mean, 0.0)
    scale = jax.lax.rsqrt(var + EPS)          # EUP slot
    if gamma is not None:
        scale = scale * gamma
    shift = -mean * scale
    if beta is not None:
        shift = shift + beta
    return h * scale + shift                   # 2 VPU ops / element


# ----------------------------------------------------------------------------
# kernels
# ----------------------------------------------------------------------------
def _projection_kernel(x_ref, w1_ref, g1_ref, b1_ref,
                       w2_ref, g2_ref, b2_ref,
                       w3_ref, o_ref):
    inv_n = 1.0 / x_ref.shape[0]
    mm_dtype = w1_ref.dtype

    # Block 1: Linear(no bias) -> BN(affine) -> ReLU
    h = jnp.dot(x_ref[...], w1_ref[...], preferred_element_type=jnp.float32)
    h = jnp.maximum(_bn_train(h, inv_n, g1_ref[...], b1_ref[...]), 0.0)

    # Block 2: Linear(no bias) -> BN(affine) -> ReLU
    h = jnp.dot(h.astype(mm_dtype), w2_ref[...],
                preferred_element_type=jnp.float32)
    h = jnp.maximum(_bn_train(h, inv_n, g2_ref[...], b2_ref[...]), 0.0)

    # Block 3: Linear(no bias) -> BN(no affine)
    h = jnp.dot(h.astype(mm_dtype), w3_ref[...],
                preferred_element_type=jnp.float32)
    h = _bn_train(h, inv_n)

    o_ref[...] = h.astype(o_ref.dtype)


def _prediction_kernel(x_ref, w1_ref, g1_ref, b1_ref,
                       w2_ref, bias2_ref, o_ref):
    inv_n = 1.0 / x_ref.shape[0]
    mm_dtype = w1_ref.dtype

    # Linear(no bias) -> BN(affine) -> ReLU
    h = jnp.dot(x_ref[...], w1_ref[...], preferred_element_type=jnp.float32)
    h = jnp.maximum(_bn_train(h, inv_n, g1_ref[...], b1_ref[...]), 0.0)

    # Linear(with bias)
    h = jnp.dot(h.astype(mm_dtype), w2_ref[...],
                preferred_element_type=jnp.float32)
    o_ref[...] = (h + bias2_ref[...]).astype(o_ref.dtype)


# ----------------------------------------------------------------------------
# pallas_call wrappers
# ----------------------------------------------------------------------------
def _full_spec(shape):
    nd = len(shape)
    return pl.BlockSpec(shape, lambda i, _nd=nd: (0,) * _nd)


def _call(kernel, args, out_shape):
    return pl.pallas_call(
        kernel,
        out_shape=jax.ShapeDtypeStruct(out_shape, jnp.float32),
        grid=(1,),
        in_specs=[_full_spec(a.shape) for a in args],
        out_specs=_full_spec(out_shape),
        compiler_params=pltpu.CompilerParams(
            dimension_semantics=("arbitrary",)),
    )(*args)


def simsiam_projection_head(x, w1, g1, b1, w2, g2, b2, w3,
                            *, mm_dtype=jnp.bfloat16):
    """Weights are stored as (in_features, out_features): kernel computes x @ W."""
    n, in_dim = x.shape
    hid = w1.shape[1]
    out_dim = w3.shape[1]
    in_p = _round_up(in_dim, LANE)
    hid_p = _round_up(hid, LANE)
    out_p = _round_up(out_dim, LANE)

    # Lane-dense padding: zero weight columns + zero gamma/beta keep padded
    # feature lanes exactly zero through every BN/ReLU stage (per-feature
    # stats of real lanes are untouched); pad is sliced off at the end.
    xp = _pad_axis(x, in_p, 1).astype(mm_dtype)
    w1p = _pad_axis(_pad_axis(w1, in_p, 0), hid_p, 1).astype(mm_dtype)
    w2p = _pad_axis(_pad_axis(w2, hid_p, 0), hid_p, 1).astype(mm_dtype)
    w3p = _pad_axis(_pad_axis(w3, hid_p, 0), out_p, 1).astype(mm_dtype)
    g1p = _pad_axis(g1.astype(jnp.float32), hid_p, 1)
    b1p = _pad_axis(b1.astype(jnp.float32), hid_p, 1)
    g2p = _pad_axis(g2.astype(jnp.float32), hid_p, 1)
    b2p = _pad_axis(b2.astype(jnp.float32), hid_p, 1)

    args = (xp, w1p, g1p, b1p, w2p, g2p, b2p, w3p)
    out = _call(_projection_kernel, args, (n, out_p))
    return out[:, :out_dim]


def simsiam_prediction_head(x, w1, g1, b1, w2, bias2,
                            *, mm_dtype=jnp.bfloat16):
    n, in_dim = x.shape
    hid = w1.shape[1]
    out_dim = w2.shape[1]
    in_p = _round_up(in_dim, LANE)
    hid_p = _round_up(hid, LANE)
    out_p = _round_up(out_dim, LANE)

    xp = _pad_axis(x, in_p, 1).astype(mm_dtype)
    w1p = _pad_axis(_pad_axis(w1, in_p, 0), hid_p, 1).astype(mm_dtype)
    g1p = _pad_axis(g1.astype(jnp.float32), hid_p, 1)
    b1p = _pad_axis(b1.astype(jnp.float32), hid_p, 1)
    w2p = _pad_axis(_pad_axis(w2, hid_p, 0), out_p, 1).astype(mm_dtype)
    bias2p = _pad_axis(bias2.astype(jnp.float32), out_p, 1)

    args = (xp, w1p, g1p, b1p, w2p, bias2p)
    out = _call(_prediction_kernel, args, (n, out_p))
    return out[:, :out_dim]


def simsiam_heads_forward(features, proj_params, pred_params):
    """SimSiam forward minus the backbone: returns (p, z)."""
    z = simsiam_projection_head(features, *proj_params)
    p = simsiam_prediction_head(z, *pred_params)
    return p, z


# ----------------------------------------------------------------------------
# pure-JAX references (same precision path: bf16 matmul operands, f32 BN)
# ----------------------------------------------------------------------------
def _bn_ref(h, gamma=None, beta=None):
    mean = jnp.mean(h, axis=0, keepdims=True)
    var = jnp.mean((h - mean) ** 2, axis=0, keepdims=True)
    hn = (h - mean) * jax.lax.rsqrt(var + EPS)
    if gamma is not None:
        hn = hn * gamma + beta
    return hn


def _mm_ref(a, b, mm_dtype):
    return jnp.dot(a.astype(mm_dtype), b.astype(mm_dtype),
                   preferred_element_type=jnp.float32)


def projection_reference(x, w1, g1, b1, w2, g2, b2, w3,
                         mm_dtype=jnp.bfloat16):
    h = jnp.maximum(_bn_ref(_mm_ref(x, w1, mm_dtype), g1, b1), 0.0)
    h = jnp.maximum(_bn_ref(_mm_ref(h, w2, mm_dtype), g2, b2), 0.0)
    return _bn_ref(_mm_ref(h, w3, mm_dtype))


def prediction_reference(x, w1, g1, b1, w2, bias2, mm_dtype=jnp.bfloat16):
    h = jnp.maximum(_bn_ref(_mm_ref(x, w1, mm_dtype), g1, b1), 0.0)
    return _mm_ref(h, w2, mm_dtype) + bias2


# ----------------------------------------------------------------------------
# test
# ----------------------------------------------------------------------------
if __name__ == "__main__":
    key = jax.random.PRNGKey(0)
    batch = 8
    ftr_dim, proj_hidden, out_dim, pred_hidden = 32, 64, 32, 16

    k = jax.random.split(key, 10)
    # "backbone features" stand-in (backbone itself is not translated here)
    f = jax.random.normal(k[0], (batch, ftr_dim), jnp.float32)

    # projector params; linear weights stored as (in, out)
    w1 = jax.random.normal(k[1], (ftr_dim, proj_hidden), jnp.float32) / jnp.sqrt(ftr_dim)
    w2 = jax.random.normal(k[2], (proj_hidden, proj_hidden), jnp.float32) / jnp.sqrt(proj_hidden)
    w3 = jax.random.normal(k[3], (proj_hidden, out_dim), jnp.float32) / jnp.sqrt(proj_hidden)
    g1 = 1.0 + 0.1 * jax.random.normal(k[4], (1, proj_hidden), jnp.float32)
    b1 = 0.1 * jax.random.normal(k[5], (1, proj_hidden), jnp.float32)
    g2 = jnp.ones((1, proj_hidden), jnp.float32)
    b2 = jnp.zeros((1, proj_hidden), jnp.float32)

    # predictor params
    pw1 = jax.random.normal(k[6], (out_dim, pred_hidden), jnp.float32) / jnp.sqrt(out_dim)
    pg1 = 1.0 + 0.1 * jax.random.normal(k[7], (1, pred_hidden), jnp.float32)
    pb1 = 0.1 * jax.random.normal(k[8], (1, pred_hidden), jnp.float32)
    pw2 = jax.random.normal(k[9], (pred_hidden, out_dim), jnp.float32) / jnp.sqrt(pred_hidden)
    pbias2 = 0.1 * jnp.ones((1, out_dim), jnp.float32)

    proj_params = (w1, g1, b1, w2, g2, b2, w3)
    pred_params = (pw1, pg1, pb1, pw2, pbias2)

    p, z = simsiam_heads_forward(f, proj_params, pred_params)
    p, z = jax.block_until_ready((p, z))

    assert z.shape == (batch, out_dim)
    assert p.shape == (batch, out_dim)

    z_ref = projection_reference(f, *proj_params)
    # test the prediction kernel against a reference fed with the same z
    p_ref = prediction_reference(z, *pred_params)

    assert jnp.allclose(z, z_ref, atol=1e-2, rtol=1e-2), "projection mismatch"
    assert jnp.allclose(p, p_ref, atol=1e-2, rtol=1e-2), "prediction mismatch"

    print("KERNEL_OK")
</pallas_src>

<mosaic_0001>
module attributes {stable_mosaic.version = 11 : i64} {
  func.func @_projection_kernel(%arg0: i32, %arg1: memref<8x128xbf16, #tpu.memory_space<vmem>>, %arg2: memref<128x128xbf16, #tpu.memory_space<vmem>>, %arg3: memref<1x128xf32, #tpu.memory_space<vmem>>, %arg4: memref<1x128xf32, #tpu.memory_space<vmem>>, %arg5: memref<128x128xbf16, #tpu.memory_space<vmem>>, %arg6: memref<1x128xf32, #tpu.memory_space<vmem>>, %arg7: memref<1x128xf32, #tpu.memory_space<vmem>>, %arg8: memref<128x128xbf16, #tpu.memory_space<vmem>>, %arg9: memref<8x128xf32, #tpu.memory_space<vmem>>) attributes {dimension_semantics = [#tpu.dimension_semantics<arbitrary>], iteration_bounds = array<i64: 1>, scalar_prefetch = 0 : i64, scratch_operands = 0 : i64, tpu.core_type = #tpu.core_type<tc>, window_params = [{pipeline_mode = #tpu.pipeline_mode<synchronous>, transform_indices = @transform_0, window_bounds = array<i64: 8, 128>}, {pipeline_mode = #tpu.pipeline_mode<synchronous>, transform_indices = @transform_1, window_bounds = array<i64: 128, 128>}, {pipeline_mode = #tpu.pipeline_mode<synchronous>, transform_indices = @transform_2, window_bounds = array<i64: 1, 128>}, {pipeline_mode = #tpu.pipeline_mode<synchronous>, transform_indices = @transform_3, window_bounds = array<i64: 1, 128>}, {pipeline_mode = #tpu.pipeline_mode<synchronous>, transform_indices = @transform_4, window_bounds = array<i64: 128, 128>}, {pipeline_mode = #tpu.pipeline_mode<synchronous>, transform_indices = @transform_5, window_bounds = array<i64: 1, 128>}, {pipeline_mode = #tpu.pipeline_mode<synchronous>, transform_indices = @transform_6, window_bounds = array<i64: 1, 128>}, {pipeline_mode = #tpu.pipeline_mode<synchronous>, transform_indices = @transform_7, window_bounds = array<i64: 128, 128>}, {pipeline_mode = #tpu.pipeline_mode<synchronous>, transform_indices = @transform_8, window_bounds = array<i64: 8, 128>}]} {
    %c0 = arith.constant 0 : index
    %c0_0 = arith.constant 0 : index
    %0 = vector.load %arg1[%c0, %c0_0] : memref<8x128xbf16, #tpu.memory_space<vmem>>, vector<8x128xbf16>
    %c0_1 = arith.constant 0 : index
    %c0_2 = arith.constant 0 : index
    %1 = vector.load %arg2[%c0_1, %c0_2] : memref<128x128xbf16, #tpu.memory_space<vmem>>, vector<128x128xbf16>
    %cst = arith.constant dense<0.000000e+00> : vector<8x128xf32>
    %2 = tpu.matmul %0, %1, %cst {dimension_numbers = #tpu.dot_dimension_numbers<[1], [0], [0], [1], [0, 0, 1, 1], [], []>} : vector<8x128xbf16>, vector<128x128xbf16>, vector<8x128xf32> -> vector<8x128xf32>
    %c0_3 = arith.constant 0 : index
    %c0_4 = arith.constant 0 : index
    %3 = vector.load %arg3[%c0_3, %c0_4] : memref<1x128xf32, #tpu.memory_space<vmem>>, vector<1x128xf32>
    %c0_5 = arith.constant 0 : index
    %c0_6 = arith.constant 0 : index
    %4 = vector.load %arg4[%c0_5, %c0_6] : memref<1x128xf32, #tpu.memory_space<vmem>>, vector<1x128xf32>
    %cst_7 = arith.constant dense<0.000000e+00> : vector<128xf32>
    %5 = vector.multi_reduction <add>, %2, %cst_7 [0] : vector<8x128xf32> to vector<128xf32>
    %6 = vector.shape_cast %5 : vector<128xf32> to vector<1x128xf32>
    %7 = arith.mulf %2, %2 : vector<8x128xf32>
    %cst_8 = arith.constant dense<0.000000e+00> : vector<128xf32>
    %8 = vector.multi_reduction <add>, %7, %cst_8 [0] : vector<8x128xf32> to vector<128xf32>
    %9 = vector.shape_cast %8 : vector<128xf32> to vector<1x128xf32>
    %cst_9 = arith.constant 1.250000e-01 : f32
    %10 = vector.broadcast %cst_9 : f32 to vector<1x128xf32>
    %11 = arith.mulf %6, %10 : vector<1x128xf32>
    %cst_10 = arith.constant 1.250000e-01 : f32
    %12 = vector.broadcast %cst_10 : f32 to vector<1x128xf32>
    %13 = arith.mulf %9, %12 : vector<1x128xf32>
    %14 = arith.mulf %11, %11 : vector<1x128xf32>
    %15 = arith.subf %13, %14 : vector<1x128xf32>
    %cst_11 = arith.constant 0.000000e+00 : f32
    %16 = vector.broadcast %cst_11 : f32 to vector<1x128xf32>
    %17 = arith.maximumf %15, %16 : vector<1x128xf32>
    %cst_12 = arith.constant 9.99999974E-6 : f32
    %18 = vector.broadcast %cst_12 : f32 to vector<1x128xf32>
    %19 = arith.addf %17, %18 : vector<1x128xf32>
    %20 = math.rsqrt %19 : vector<1x128xf32>
    %21 = arith.mulf %20, %3 : vector<1x128xf32>
    %cst_13 = arith.constant 0.000000e+00 : f32
    %22 = vector.broadcast %cst_13 : f32 to vector<1x128xf32>
    %23 = arith.subf %22, %11 : vector<1x128xf32>
    %24 = arith.mulf %23, %21 : vector<1x128xf32>
    %25 = arith.addf %24, %4 : vector<1x128xf32>
    %26 = vector.broadcast %21 : vector<1x128xf32> to vector<8x128xf32>
    %27 = arith.mulf %2, %26 : vector<8x128xf32>
    %28 = vector.broadcast %25 : vector<1x128xf32> to vector<8x128xf32>
    %29 = arith.addf %27, %28 : vector<8x128xf32>
    %cst_14 = arith.constant 0.000000e+00 : f32
    %30 = vector.broadcast %cst_14 : f32 to vector<8x128xf32>
    %31 = arith.maximumf %29, %30 : vector<8x128xf32>
    %32 = arith.truncf %31 : vector<8x128xf32> to vector<8x128xbf16>
    %c0_15 = arith.constant 0 : index
    %c0_16 = arith.constant 0 : index
    %33 = vector.load %arg5[%c0_15, %c0_16] : memref<128x128xbf16, #tpu.memory_space<vmem>>, vector<128x128xbf16>
    %cst_17 = arith.constant dense<0.000000e+00> : vector<8x128xf32>
    %34 = tpu.matmul %32, %33, %cst_17 {dimension_numbers = #tpu.dot_dimension_numbers<[1], [0], [0], [1], [0, 0, 1, 1], [], []>} : vector<8x128xbf16>, vector<128x128xbf16>, vector<8x128xf32> -> vector<8x128xf32>
    %c0_18 = arith.constant 0 : index
    %c0_19 = arith.constant 0 : index
    %35 = vector.load %arg6[%c0_18, %c0_19] : memref<1x128xf32, #tpu.memory_space<vmem>>, vector<1x128xf32>
    %c0_20 = arith.constant 0 : index
    %c0_21 = arith.constant 0 : index
    %36 = vector.load %arg7[%c0_20, %c0_21] : memref<1x128xf32, #tpu.memory_space<vmem>>, vector<1x128xf32>
    %cst_22 = arith.constant dense<0.000000e+00> : vector<128xf32>
    %37 = vector.multi_reduction <add>, %34, %cst_22 [0] : vector<8x128xf32> to vector<128xf32>
    %38 = vector.shape_cast %37 : vector<128xf32> to vector<1x128xf32>
    %39 = arith.mulf %34, %34 : vector<8x128xf32>
    %cst_23 = arith.constant dense<0.000000e+00> : vector<128xf32>
    %40 = vector.multi_reduction <add>, %39, %cst_23 [0] : vector<8x128xf32> to vector<128xf32>
    %41 = vector.shape_cast %40 : vector<128xf32> to vector<1x128xf32>
    %cst_24 = arith.constant 1.250000e-01 : f32
    %42 = vector.broadcast %cst_24 : f32 to vector<1x128xf32>
    %43 = arith.mulf %38, %42 : vector<1x128xf32>
    %cst_25 = arith.constant 1.250000e-01 : f32
    %44 = vector.broadcast %cst_25 : f32 to vector<1x128xf32>
    %45 = arith.mulf %41, %44 : vector<1x128xf32>
    %46 = arith.mulf %43, %43 : vector<1x128xf32>
    %47 = arith.subf %45, %46 : vector<1x128xf32>
    %cst_26 = arith.constant 0.000000e+00 : f32
    %48 = vector.broadcast %cst_26 : f32 to vector<1x128xf32>
    %49 = arith.maximumf %47, %48 : vector<1x128xf32>
    %cst_27 = arith.constant 9.99999974E-6 : f32
    %50 = vector.broadcast %cst_27 : f32 to vector<1x128xf32>
    %51 = arith.addf %49, %50 : vector<1x128xf32>
    %52 = math.rsqrt %51 : vector<1x128xf32>
    %53 = arith.mulf %52, %35 : vector<1x128xf32>
    %cst_28 = arith.constant 0.000000e+00 : f32
    %54 = vector.broadcast %cst_28 : f32 to vector<1x128xf32>
    %55 = arith.subf %54, %43 : vector<1x128xf32>
    %56 = arith.mulf %55, %53 : vector<1x128xf32>
    %57 = arith.addf %56, %36 : vector<1x128xf32>
    %58 = vector.broadcast %53 : vector<1x128xf32> to vector<8x128xf32>
    %59 = arith.mulf %34, %58 : vector<8x128xf32>
    %60 = vector.broadcast %57 : vector<1x128xf32> to vector<8x128xf32>
    %61 = arith.addf %59, %60 : vector<8x128xf32>
    %cst_29 = arith.constant 0.000000e+00 : f32
    %62 = vector.broadcast %cst_29 : f32 to vector<8x128xf32>
    %63 = arith.maximumf %61, %62 : vector<8x128xf32>
    %64 = arith.truncf %63 : vector<8x128xf32> to vector<8x128xbf16>
    %c0_30 = arith.constant 0 : index
    %c0_31 = arith.constant 0 : index
    %65 = vector.load %arg8[%c0_30, %c0_31] : memref<128x128xbf16, #tpu.memory_space<vmem>>, vector<128x128xbf16>
    %cst_32 = arith.constant dense<0.000000e+00> : vector<8x128xf32>
    %66 = tpu.matmul %64, %65, %cst_32 {dimension_numbers = #tpu.dot_dimension_numbers<[1], [0], [0], [1], [0, 0, 1, 1], [], []>} : vector<8x128xbf16>, vector<128x128xbf16>, vector<8x128xf32> -> vector<8x128xf32>
    %cst_33 = arith.constant dense<0.000000e+00> : vector<128xf32>
    %67 = vector.multi_reduction <add>, %66, %cst_33 [0] : vector<8x128xf32> to vector<128xf32>
    %68 = vector.shape_cast %67 : vector<128xf32> to vector<1x128xf32>
    %69 = arith.mulf %66, %66 : vector<8x128xf32>
    %cst_34 = arith.constant dense<0.000000e+00> : vector<128xf32>
    %70 = vector.multi_reduction <add>, %69, %cst_34 [0] : vector<8x128xf32> to vector<128xf32>
    %71 = vector.shape_cast %70 : vector<128xf32> to vector<1x128xf32>
    %cst_35 = arith.constant 1.250000e-01 : f32
    %72 = vector.broadcast %cst_35 : f32 to vector<1x128xf32>
    %73 = arith.mulf %68, %72 : vector<1x128xf32>
    %cst_36 = arith.constant 1.250000e-01 : f32
    %74 = vector.broadcast %cst_36 : f32 to vector<1x128xf32>
    %75 = arith.mulf %71, %74 : vector<1x128xf32>
    %76 = arith.mulf %73, %73 : vector<1x128xf32>
    %77 = arith.subf %75, %76 : vector<1x128xf32>
    %cst_37 = arith.constant 0.000000e+00 : f32
    %78 = vector.broadcast %cst_37 : f32 to vector<1x128xf32>
    %79 = arith.maximumf %77, %78 : vector<1x128xf32>
    %cst_38 = arith.constant 9.99999974E-6 : f32
    %80 = vector.broadcast %cst_38 : f32 to vector<1x128xf32>
    %81 = arith.addf %79, %80 : vector<1x128xf32>
    %82 = math.rsqrt %81 : vector<1x128xf32>
    %cst_39 = arith.constant 0.000000e+00 : f32
    %83 = vector.broadcast %cst_39 : f32 to vector<1x128xf32>
    %84 = arith.subf %83, %73 : vector<1x128xf32>
    %85 = arith.mulf %84, %82 : vector<1x128xf32>
    %86 = vector.broadcast %82 : vector<1x128xf32> to vector<8x128xf32>
    %87 = arith.mulf %66, %86 : vector<8x128xf32>
    %88 = vector.broadcast %85 : vector<1x128xf32> to vector<8x128xf32>
    %89 = arith.addf %87, %88 : vector<8x128xf32>
    %c0_40 = arith.constant 0 : index
    %c0_41 = arith.constant 0 : index
    %90 = vector.load %arg9[%c0_40, %c0_41] : memref<8x128xf32, #tpu.memory_space<vmem>>, vector<8x128xf32>
    tpu.vector_store %arg9[%c0_40, %c0_41], %89 {strides = array<i32>} : memref<8x128xf32, #tpu.memory_space<vmem>>, vector<8x128xf32>,
    return
  }
  func.func @transform_0(%arg0: i32) -> (i32, i32) {
    %c0_i32 = arith.constant 0 : i32
    %c0_i32_0 = arith.constant 0 : i32
    %c0_i32_1 = arith.constant 0 : i32
    return %c0_i32, %c0_i32_0 : i32, i32
  }
  func.func @transform_1(%arg0: i32) -> (i32, i32) {
    %c0_i32 = arith.constant 0 : i32
    %c0_i32_0 = arith.constant 0 : i32
    %c0_i32_1 = arith.constant 0 : i32
    return %c0_i32, %c0_i32_0 : i32, i32
  }
  func.func @transform_2(%arg0: i32) -> (i32, i32) {
    %c0_i32 = arith.constant 0 : i32
    %c0_i32_0 = arith.constant 0 : i32
    %c0_i32_1 = arith.constant 0 : i32
    return %c0_i32, %c0_i32_0 : i32, i32
  }
  func.func @transform_3(%arg0: i32) -> (i32, i32) {
    %c0_i32 = arith.constant 0 : i32
    %c0_i32_0 = arith.constant 0 : i32
    %c0_i32_1 = arith.constant 0 : i32
    return %c0_i32, %c0_i32_0 : i32, i32
  }
  func.func @transform_4(%arg0: i32) -> (i32, i32) {
    %c0_i32 = arith.constant 0 : i32
    %c0_i32_0 = arith.constant 0 : i32
    %c0_i32_1 = arith.constant 0 : i32
    return %c0_i32, %c0_i32_0 : i32, i32
  }
  func.func @transform_5(%arg0: i32) -> (i32, i32) {
    %c0_i32 = arith.constant 0 : i32
    %c0_i32_0 = arith.constant 0 : i32
    %c0_i32_1 = arith.constant 0 : i32
    return %c0_i32, %c0_i32_0 : i32, i32
  }
  func.func @transform_6(%arg0: i32) -> (i32, i32) {
    %c0_i32 = arith.constant 0 : i32
    %c0_i32_0 = arith.constant 0 : i32
    %c0_i32_1 = arith.constant 0 : i32
    return %c0_i32, %c0_i32_0 : i32, i32
  }
  func.func @transform_7(%arg0: i32) -> (i32, i32) {
    %c0_i32 = arith.constant 0 : i32
    %c0_i32_0 = arith.constant 0 : i32
    %c0_i32_1 = arith.constant 0 : i32
    return %c0_i32, %c0_i32_0 : i32, i32
  }
  func.func @transform_8(%arg0: i32) -> (i32, i32) {
    %c0_i32 = arith.constant 0 : i32
    %c0_i32_0 = arith.constant 0 : i32
    %c0_i32_1 = arith.constant 0 : i32
    return %c0_i32, %c0_i32_0 : i32, i32
  }
}

</mosaic_0001>

<bundles_post_ra>
// kernel: tpu_custom_call.1
= control target key start
LH: loop header
LB: loop body
LE: loop exit
PB: predicated region body
PF: predicated region fallthrough
CT: control target
= control target key end

     0   :  { %13 = vsyncpa [#allocation3], 0  ;;  %s954_s0 = inlined_call_operand.hbm [shape: bf16[8,128], index: 0, kind: input, shape index: {}]   ;;  %s955_s1 = inlined_call_operand.hbm [shape: bf16[128,128], index: 1, kind: input, shape index: {}]   ;;  %s956_s2 = inlined_call_operand.vmem [shape: f32[1,128], index: 2, kind: input, shape index: {}]   ;;  %s957_s3 = inlined_call_operand.vmem [shape: f32[1,128], index: 3, kind: input, shape index: {}]   ;;  %s958_s4 = inlined_call_operand.hbm [shape: bf16[128,128], index: 4, kind: input, shape index: {}]   ;;  %s959_s5 = inlined_call_operand.vmem [shape: f32[1,128], index: 5, kind: input, shape index: {}]   ;;  %s960_s6 = inlined_call_operand.vmem [shape: f32[1,128], index: 6, kind: input, shape index: {}]   ;;  %s961_s7 = inlined_call_operand.hbm [shape: bf16[128,128], index: 7, kind: input, shape index: {}]   ;;  %s962_s8 = inlined_call_operand.hbm [shape: f32[8,128], index: 8, kind: output, shape index: {}]  }
   0x1   :  { %14 = vsyncpa [#allocation6], 0 }
   0x2   :  { %15 = vsyncpa [#allocation9], 0 }
   0x3   :  { %16 = vsyncpa [#allocation4], 0  ;;  %s783_s27 = smov [#allocation5]   ;;  %s665_s9 = scalar_lea.hbm %s955_s1, 1024 }
   0x4   :  { %s32_s28 = sshll.u32 %s783_s27, 4  ;;  %p666_p0 = scmp.ne.s32.totalorder %s955_s1, %s665_s9  ;;  %s33_s28 = int_to_ptr.vmem [resolvable:$true] %s32_s28 }
   0x5   :  { %p669_p1 = scmp.lt.u32.totalorder %s665_s9, %s955_s1 }
   0x7   :  { %p671_p2 = pnand %p669_p1, %p666_p0 }
   0x9   :  { %674 = shalt.err (!%p671_p2)
}
   0xa   :  { %s675_s14 = scalar_lea.vmem %s33_s28, 1024  ;;  %p680_p4 = scmp.lt.s32.totalorder %s33_s28, %s33_s28 }
   0xb   :  { %p676_p3 = scmp.ne.s32.totalorder %s33_s28, %s675_s14  ;;  %p681_p5 = scmp.lt.s32.totalorder %s675_s14, %s675_s14 }
   0xd   :  { %p682_p6 = por %p681_p5, %p680_p4 }
   0xf   :  { %p683_p7 = pnand %p682_p6, %p676_p3 }
  0x11   :  { %686 = shalt.err (!%p683_p7)
}
  0x12   :  { %s784_s15 = smov 64   ;;  %s785_s16 = smov 4  }
  0x13   :  { %38 = dma.hbm_to_vmem [thread:$0]  %s955_s1, 1024, %s33_s28, [#allocation6], %s784_s15, %s784_s15, %s785_s16  }
  0x14   :  { %s786_s19 = smov [#allocation2]   ;;  %s787_s21 = smov [#allocation7]  }
  0x15   :  { %s23_s20 = sshll.u32 %s786_s19, 4  ;;  %s48_s22 = sshll.u32 %s787_s21, 4  ;;  %s24_s20 = int_to_ptr.vmem [resolvable:$true] %s23_s20  ;;  %s49_s22 = int_to_ptr.vmem [resolvable:$true] %s48_s22 }
  0x16   :  { %s687_s25 = scalar_lea.hbm %s954_s0, 64 }
  0x17   :  { %p688_p8 = scmp.ne.s32.totalorder %s954_s0, %s687_s25  ;;  %p691_p9 = scmp.lt.u32.totalorder %s687_s25, %s954_s0 }
  0x19   :  { %p693_p10 = pnand %p691_p9, %p688_p8 }
  0x1b   :  { %696 = shalt.err (!%p693_p10)
}
  0x1c   :  { %s697_s1 = scalar_lea.vmem %s24_s20, 64  ;;  %p702_p12 = scmp.lt.s32.totalorder %s24_s20, %s24_s20 }
  0x1d   :  { %p698_p11 = scmp.ne.s32.totalorder %s24_s20, %s697_s1  ;;  %p703_p13 = scmp.lt.s32.totalorder %s697_s1, %s697_s1 }
  0x1f   :  { %p704_p0 = por %p703_p13, %p702_p12 }
  0x21   :  { %p705_p1 = pnand %p704_p0, %p698_p11 }
  0x23   :  { %708 = shalt.err (!%p705_p1)
}
  0x24   :  { %26 = dma.hbm_to_vmem [thread:$0]  %s954_s0, 64, %s24_s20, [#allocation3]  }
  0x25   :  { %s709_s12 = scalar_lea.hbm %s958_s4, 1024 }
  0x26   :  { %p710_p2 = scmp.ne.s32.totalorder %s958_s4, %s709_s12  ;;  %p713_p3 = scmp.lt.u32.totalorder %s709_s12, %s958_s4 }
  0x28   :  { %p715_p4 = pnand %p713_p3, %p710_p2 }
  0x2a   :  { %718 = shalt.err (!%p715_p4)
}
  0x2b   :  { %s719_s19 = scalar_lea.vmem %s49_s22, 1024  ;;  %p724_p6 = scmp.lt.s32.totalorder %s49_s22, %s49_s22 }
  0x2c   :  { %p720_p5 = scmp.ne.s32.totalorder %s49_s22, %s719_s19  ;;  %p725_p7 = scmp.lt.s32.totalorder %s719_s19, %s719_s19 }
  0x2e   :  { %p726_p8 = por %p725_p7, %p724_p6 }
  0x30   :  { %p727_p9 = pnand %p726_p8, %p720_p5 }
  0x32   :  { %730 = shalt.err (!%p727_p9)
}
  0x33   :  { %54 = dma.hbm_to_vmem [thread:$0]  %s958_s4, 1024, %s49_s22, [#allocation6], %s784_s15, %s784_s15, %s785_s16  }
  0x34   :  { %s788_s21 = smov [#allocation8]   ;;  %s731_s26 = scalar_lea.hbm %s961_s7, 1024 }
  0x35   :  { %s64_s23 = sshll.u32 %s788_s21, 4  ;;  %p732_p10 = scmp.ne.s32.totalorder %s961_s7, %s731_s26  ;;  %s65_s23 = int_to_ptr.vmem [resolvable:$true] %s64_s23 }
  0x36   :  { %p735_p11 = scmp.lt.u32.totalorder %s731_s26, %s961_s7 }
  0x38   :  { %p737_p12 = pnand %p735_p11, %p732_p10 }
  0x3a   :  { %740 = shalt.err (!%p737_p12)
}
  0x3b   :  { %s741_s28 = scalar_lea.vmem %s65_s23, 1024  ;;  %p746_p0 = scmp.lt.s32.totalorder %s65_s23, %s65_s23 }
  0x3c   :  { %p742_p13 = scmp.ne.s32.totalorder %s65_s23, %s741_s28  ;;  %p747_p1 = scmp.lt.s32.totalorder %s741_s28, %s741_s28 }
  0x3e   :  { %p748_p2 = por %p747_p1, %p746_p0 }
  0x40   :  { %p749_p3 = pnand %p748_p2, %p742_p13 }
  0x42   :  { %752 = shalt.err (!%p749_p3)
}
  0x43   :  { %70 = dma.hbm_to_vmem [thread:$0]  %s961_s7, 1024, %s65_s23, [#allocation9], %s784_s15, %s784_s15, %s785_s16  }
  0x44   :  { %775 = dma.done.wait [#allocation3], 64  }
  0x45   :  { %776 = vsyncadd [#allocation3], 4294967232 }
  0x46   :  { %777 = dma.done.wait [#allocation6], 2048  }
  0x47   :  { %778 = vsyncadd [#allocation6], 4294965248 }
  0x48   :  { %779 = dma.done.wait [#allocation9], 1024  }
  0x49   :  { %780 = vsyncadd [#allocation9], 4294966272  ;;  %v789_v0 = vmov 0.0   ;;  %vm790_vm0 = vmmov 0   ;;  %v635_v1 = vld [vmem:[#allocation5] sm:$0xff]   ;;  %v636_v2 = vld [vmem:[#allocation5 + $0x8] sm:$0xff]   ;;  %v215_v41 = vlaneseq }
  0x4a   :  { %566 = vmatprep.subr.bf16.mxu0 %v789_v0  ;;  %582 = vmatprep.mubr.msk.bf16.mxu0 %vm790_vm0, %v789_v0  ;;  %v637_v3 = vld [vmem:[#allocation5 + $0x10] sm:$0xff]   ;;  %v638_v4 = vld [vmem:[#allocation5 + $0x18] sm:$0xff]   ;;  %v639_v5 = vld [vmem:[#allocation5 + $0x20] sm:$0xff]  }
  0x4b   :  { %586 = vmatprep.subr.bf16.mxu1 %v789_v0  ;;  %602 = vmatprep.mubr.msk.bf16.mxu1 %vm790_vm0, %v789_v0  ;;  %v640_v6 = vld [vmem:[#allocation5 + $0x28] sm:$0xff]   ;;  %v641_v7 = vld [vmem:[#allocation5 + $0x30] sm:$0xff]   ;;  %v642_v8 = vld [vmem:[#allocation5 + $0x38] sm:$0xff]   ;;  %v216_v42 = vshrl.u32 %v215_v41, 7 }
  0x4c   :  { %567 = vmatpush3.bf16.msra.mxu0 %v635_v1  ;;  %v84_v9 = vld [vmem:[#allocation2] sm:$0xf]  ;;  %v643_v10 = vld [vmem:[#allocation7] sm:$0xff]   ;;  %v644_v11 = vld [vmem:[#allocation7 + $0x8] sm:$0xff]  }
  0x4d   :  { %568 = vmatprep.subr.bf16.mxu0 %v789_v0  ;;  %587 = vmatpush3.bf16.msra.mxu1 %v643_v10  ;;  %v645_v12 = vld [vmem:[#allocation7 + $0x10] sm:$0xff]   ;;  %v646_v13 = vld [vmem:[#allocation7 + $0x18] sm:$0xff]   ;;  %v647_v14 = vld [vmem:[#allocation7 + $0x20] sm:$0xff]   ;;  %v920_v44 = vsub.s32 0, %v216_v42 }
  0x4e   :  { %588 = vmatprep.subr.bf16.mxu1 %v789_v0  ;;  %v648_v15 = vld [vmem:[#allocation7 + $0x28] sm:$0xff]   ;;  %v649_v16 = vld [vmem:[#allocation7 + $0x30] sm:$0xff]   ;;  %v650_v17 = vld [vmem:[#allocation7 + $0x38] sm:$0xff]  }
  0x4f   :  { %v189_v43 = vld [vmem:[%s956_s2] sm:$0x1]  ;;  %v651_v57 = vld [vmem:[#allocation8] sm:$0xff]   ;;  %v652_v58 = vld [vmem:[#allocation8 + $0x8] sm:$0xff]  }
  0x50   :  { %569 = vmatpush3.bf16.msra.mxu0 %v636_v2  ;;  %v190_v48 = vld [vmem:[%s957_s3] sm:$0x1]  ;;  %v653_v59 = vld [vmem:[#allocation8 + $0x10] sm:$0xff]   ;;  %v655_v61 = vld [vmem:[#allocation8 + $0x20] sm:$0xff]  }
  0x51   :  { %570 = vmatprep.subr.bf16.mxu0 %v789_v0  ;;  %589 = vmatpush3.bf16.msra.mxu1 %v644_v11  ;;  %v654_v60 = vld [vmem:[#allocation8 + $0x18] sm:$0xff]   ;;  %v656_v62 = vld [vmem:[#allocation8 + $0x28] sm:$0xff]   ;;  %v657_v63 = vld [vmem:[#allocation8 + $0x30] sm:$0xff]  }
  0x52   :  { %590 = vmatprep.subr.bf16.mxu1 %v789_v0  ;;  %v658_v1 = vld [vmem:[#allocation8 + $0x38] sm:$0xff]  }
  0x54   :  { %571 = vmatpush3.bf16.msra.mxu0 %v637_v3 }
  0x55   :  { %572 = vmatprep.subr.bf16.mxu0 %v789_v0  ;;  %591 = vmatpush3.bf16.msra.mxu1 %v645_v12 }
  0x56   :  { %592 = vmatprep.subr.bf16.mxu1 %v789_v0 }
  0x58   :  { %573 = vmatpush3.bf16.msra.mxu0 %v638_v4 }
  0x59   :  { %574 = vmatprep.subr.bf16.mxu0 %v789_v0  ;;  %593 = vmatpush3.bf16.msra.mxu1 %v646_v13 }
  0x5a   :  { %594 = vmatprep.subr.bf16.mxu1 %v789_v0 }
  0x5c   :  { %575 = vmatpush3.bf16.msra.mxu0 %v639_v5 }
  0x5d   :  { %576 = vmatprep.subr.bf16.mxu0 %v789_v0  ;;  %595 = vmatpush3.bf16.msra.mxu1 %v647_v14 }
  0x5e   :  { %596 = vmatprep.subr.bf16.mxu1 %v789_v0 }
  0x60   :  { %577 = vmatpush3.bf16.msra.mxu0 %v640_v6 }
  0x61   :  { %578 = vmatprep.subr.bf16.mxu0 %v789_v0  ;;  %597 = vmatpush3.bf16.msra.mxu1 %v648_v15 }
  0x62   :  { %598 = vmatprep.subr.bf16.mxu1 %v789_v0 }
  0x64   :  { %579 = vmatpush3.bf16.msra.mxu0 %v641_v7 }
  0x65   :  { %580 = vmatprep.subr.bf16.mxu0 %v789_v0  ;;  %599 = vmatpush3.bf16.msra.mxu1 %v649_v16 }
  0x66   :  { %600 = vmatprep.subr.bf16.mxu1 %v789_v0 }
  0x68   :  { %581 = vmatpush3.bf16.msra.mxu0 %v642_v8 }
  0x69   :  { %606 = vmatprep.subr.bf16.mxu0 %v789_v0  ;;  %601 = vmatpush3.bf16.msra.mxu1 %v650_v17 }
  0x6b   :  { %583 = vmatmul.mubr.bf16.vlgmr.msra.gmra.mrb[0].mxu0 %v84_v9 }
  0x6c   :  { %622 = vmatprep.mubr.msk.bf16.mxu0 %vm790_vm0, %v789_v0  ;;  %607 = vmatpush3.bf16.msra.mxu0 %v651_v57 }
  0x6d   :  { %608 = vmatprep.subr.bf16.mxu0 %v789_v0 }
  0x70   :  { %609 = vmatpush3.bf16.msra.mxu0 %v652_v58 }
  0x71   :  { %610 = vmatprep.subr.bf16.mxu0 %v789_v0 }
  0x74   :  { %611 = vmatpush3.bf16.msra.mxu0 %v653_v59 }
  0x75   :  { %612 = vmatprep.subr.bf16.mxu0 %v789_v0 }
  0x78   :  { %613 = vmatpush3.bf16.msra.mxu0 %v654_v60 }
  0x79   :  { %614 = vmatprep.subr.bf16.mxu0 %v789_v0 }
  0x7c   :  { %615 = vmatpush3.bf16.msra.mxu0 %v655_v61 }
  0x7d   :  { %616 = vmatprep.subr.bf16.mxu0 %v789_v0 }
  0x80   :  { %617 = vmatpush3.bf16.msra.mxu0 %v656_v62 }
  0x81   :  { %618 = vmatprep.subr.bf16.mxu0 %v789_v0 }
  0x84   :  { %619 = vmatpush3.bf16.msra.mxu0 %v657_v63 }
  0x85   :  { %620 = vmatprep.subr.bf16.mxu0 %v789_v0 }
  0x88   :  { %621 = vmatpush3.bf16.msra.mxu0 %v658_v1 }
 0x13e   :  { %v183_v18 = vpop.f32.mrb[0].mxu0 }
 0x13f   :  { %v191_v19 = vrot.slane %v183_v18, 4  ;;  %v197_v20 = vmul.f32 %v183_v18, %v183_v18  ;;  %v584_v21 = vpop.f32.mrb[1].mxu0 }
 0x140   :  { %v186_v22 = vpop.f32.mrb[2].mxu0 }
 0x141   :  { %v192_v23 = vadd.f32 %v191_v19, %v183_v18  ;;  %v198_v24 = vrot.slane %v197_v20, 4  ;;  %v585_v25 = vpop.f32.mrb[3].mxu0 }
 0x143   :  { %v193_v26 = vrot.slane %v192_v23, 2  ;;  %v199_v27 = vadd.f32 %v198_v24, %v197_v20  ;;  %v331_v24 = vld [vmem:[%s959_s5] sm:$0x1]  ;;  %s791_s5 = smov [#allocation10]  }
 0x145   :  { %v194_v28 = vadd.f32 %v193_v26, %v192_v23  ;;  %v200_v29 = vrot.slane %v199_v27, 2 }
 0x147   :  { %v195_v30 = vrot.slane %v194_v28, 1  ;;  %v201_v31 = vadd.f32 %v200_v29, %v199_v27 }
 0x149   :  { %v196_v32 = vadd.f32 %v195_v30, %v194_v28  ;;  %v202_v33 = vrot.slane %v201_v31, 1  ;;  %v332_v28 = vld [vmem:[%s960_s6] sm:$0x1]  ;;  %s504_s6 = sshll.u32 %s791_s5, 4  ;;  %s505_s6 = int_to_ptr.vmem [resolvable:$true] %s504_s6 }
 0x14a   :  { %s753_s12 = scalar_lea.vmem %s505_s6, 128  ;;  %p758_p5 = scmp.lt.s32.totalorder %s505_s6, %s505_s6 }
 0x14b   :  { %v203_v34 = vadd.f32 %v202_v33, %v201_v31  ;;  %v204_v35 = vmul.f32 0.125, %v196_v32  ;;  %p754_p4 = scmp.ne.s32.totalorder %s505_s6, %s753_s12  ;;  %p759_p6 = scmp.lt.s32.totalorder %s753_s12, %s753_s12 }
 0x14d   :  { %v205_v36 = vmul.f32 0.125, %v203_v34  ;;  %v206_v37 = vmul.f32 %v204_v35, %v204_v35  ;;  %v212_v47 = vsub.f32 0.0, %v204_v35  ;;  %p760_p7 = por %p759_p6, %p758_p5 }
 0x14f   :  { %v207_v38 = vsub.f32 %v205_v36, %v206_v37  ;;  %p761_p8 = pnand %p760_p7, %p754_p4 }
 0x151   :  { %v208_v39 = vmax.f32 %v207_v38, 0.0 }
 0x153   :  { %v209_v40 = vadd.f32 1e-05, %v208_v39 }
 0x155   :  { %659 = vrsqrt.f32 %v209_v40 }
 0x15f   :  { %v660_v45 = vpop.eup %659 }
 0x160   :  { %v211_v46 = vmul.f32 %v660_v45, %v189_v43 }
 0x162   :  { %v218_v49 = vrot.slane %v211_v46, %v920_v44  ;;  %v213_v50 = vmul.f32 %v212_v47, %v211_v46 }
 0x164   :  { %v214_v51 = vadd.f32 %v213_v50, %v190_v48  ;;  %v219_v52 = vmul.f32 %v218_v49, %v183_v18 }
 0x166   :  { %v223_v53 = vrot.slane %v214_v51, %v920_v44 }
 0x168   :  { %v224_v54 = vadd.f32 %v223_v53, %v219_v52 }
 0x16a   :  { %v225_v55 = vmax.f32 %v224_v54, 0.0 }
 0x16c   :  { %v226_v56 = vpack.c.bf16 %v225_v55, %v225_v55 }
 0x16e   :  { %603 = vmatmul.mubr.bf16.vlgmr.msra.gmra.mrb[0].mxu1 %v226_v56 }
 0x241   :  { %v325_v2 = vpop.f32.mrb[0].mxu1 }
 0x242   :  { %v333_v3 = vrot.slane %v325_v2, 4  ;;  %v339_v4 = vmul.f32 %v325_v2, %v325_v2  ;;  %v604_v5 = vpop.f32.mrb[1].mxu1 }
 0x243   :  { %v328_v6 = vpop.f32.mrb[2].mxu1 }
 0x244   :  { %v334_v7 = vadd.f32 %v333_v3, %v325_v2  ;;  %v340_v8 = vrot.slane %v339_v4, 4  ;;  %v605_v9 = vpop.f32.mrb[3].mxu1 }
 0x246   :  { %v335_v10 = vrot.slane %v334_v7, 2  ;;  %v341_v11 = vadd.f32 %v340_v8, %v339_v4 }
 0x248   :  { %v336_v12 = vadd.f32 %v335_v10, %v334_v7  ;;  %v342_v13 = vrot.slane %v341_v11, 2 }
 0x24a   :  { %v337_v14 = vrot.slane %v336_v12, 1  ;;  %v343_v15 = vadd.f32 %v342_v13, %v341_v11 }
 0x24c   :  { %v338_v16 = vadd.f32 %v337_v14, %v336_v12  ;;  %v344_v17 = vrot.slane %v343_v15, 1 }
 0x24e   :  { %v345_v18 = vadd.f32 %v344_v17, %v343_v15  ;;  %v346_v0 = vmul.f32 0.125, %v338_v16 }
 0x250   :  { %v347_v19 = vmul.f32 0.125, %v345_v18  ;;  %v348_v20 = vmul.f32 %v346_v0, %v346_v0  ;;  %v354_v27 = vsub.f32 0.0, %v346_v0 }
 0x252   :  { %v349_v21 = vsub.f32 %v347_v19, %v348_v20 }
 0x254   :  { %v350_v22 = vmax.f32 %v349_v21, 0.0 }
 0x256   :  { %v351_v23 = vadd.f32 1e-05, %v350_v22 }
 0x258   :  { %661 = vrsqrt.f32 %v351_v23 }
 0x262   :  { %v662_v25 = vpop.eup %661 }
 0x263   :  { %v353_v26 = vmul.f32 %v662_v25, %v331_v24 }
 0x265   :  { %v355_v29 = vmul.f32 %v354_v27, %v353_v26  ;;  %v360_v30 = vrot.slane %v353_v26, %v920_v44 }
 0x267   :  { %v356_v31 = vadd.f32 %v355_v29, %v332_v28  ;;  %v361_v32 = vmul.f32 %v360_v30, %v325_v2 }
 0x269   :  { %v365_v33 = vrot.slane %v356_v31, %v920_v44 }
 0x26b   :  { %v366_v34 = vadd.f32 %v365_v33, %v361_v32 }
 0x26d   :  { %v367_v35 = vmax.f32 %v366_v34, 0.0 }
 0x26f   :  { %v368_v36 = vpack.c.bf16 %v367_v35, %v367_v35 }
 0x271   :  { %623 = vmatmul.mubr.bf16.vlgmr.msra.gmra.mrb[4].mxu0 %v368_v36 }
 0x344   :  { %v467_v37 = vpop.f32.mrb[4].mxu0 }
 0x345   :  { %v473_v38 = vrot.slane %v467_v37, 4  ;;  %v479_v39 = vmul.f32 %v467_v37, %v467_v37  ;;  %v624_v40 = vpop.f32.mrb[5].mxu0 }
 0x346   :  { %v470_v41 = vpop.f32.mrb[6].mxu0 }
 0x347   :  { %v474_v42 = vadd.f32 %v473_v38, %v467_v37  ;;  %v480_v43 = vrot.slane %v479_v39, 4  ;;  %v625_v45 = vpop.f32.mrb[7].mxu0 }
 0x349   :  { %v475_v46 = vrot.slane %v474_v42, 2  ;;  %v481_v47 = vadd.f32 %v480_v43, %v479_v39 }
 0x34b   :  { %v476_v48 = vadd.f32 %v475_v46, %v474_v42  ;;  %v482_v49 = vrot.slane %v481_v47, 2 }
 0x34d   :  { %v477_v50 = vrot.slane %v476_v48, 1  ;;  %v483_v51 = vadd.f32 %v482_v49, %v481_v47 }
 0x34f   :  { %v478_v52 = vadd.f32 %v477_v50, %v476_v48  ;;  %v484_v44 = vrot.slane %v483_v51, 1 }
 0x351   :  { %v485_v53 = vadd.f32 %v484_v44, %v483_v51  ;;  %v486_v54 = vmul.f32 0.125, %v478_v52 }
 0x353   :  { %v487_v55 = vmul.f32 0.125, %v485_v53  ;;  %v488_v56 = vmul.f32 %v486_v54, %v486_v54  ;;  %v493_v60 = vsub.f32 0.0, %v486_v54 }
 0x355   :  { %v489_v57 = vsub.f32 %v487_v55, %v488_v56 }
 0x357   :  { %v490_v58 = vmax.f32 %v489_v57, 0.0 }
 0x359   :  { %v491_v59 = vadd.f32 1e-05, %v490_v58 }
 0x35b   :  { %663 = vrsqrt.f32 %v491_v59 }
 0x365   :  { %v664_v61 = vpop.eup %663 }
 0x366   :  { %v494_v62 = vmul.f32 %v664_v61, %v493_v60  ;;  %v495_v63 = vmul.f32 %v664_v61, %v467_v37 }
 0x368   :  { %v496_v1 = vadd.f32 %v495_v63, %v494_v62 }
 0x36a   :  { %497 = vst [vmem:[#allocation10] sm:$0xff] %v496_v1 }
 0x36b   :  { %764 = shalt.err (!%p761_p8)
}
 0x36c   :  { %s765_s17 = scalar_lea.hbm %s962_s8, 128 }
 0x36d   :  { %p766_p9 = scmp.ne.s32.totalorder %s962_s8, %s765_s17  ;;  %p769_p10 = scmp.lt.u32.totalorder %s765_s17, %s962_s8 }
 0x36f   :  { %p771_p11 = pnand %p769_p10, %p766_p9 }
 0x371   :  { %774 = shalt.err (!%p771_p11)
}
 0x372   :  { %507 = dma.vmem_to_hbm [thread:$0]  %s505_s6, 128, %s962_s8, [#allocation4]  }
 0x373   :  { %781 = dma.done.wait [#allocation4], 128  }
 0x374   :  { %782 = vsyncadd [#allocation4], 4294967168 }
 0x375   :  { %511 = vsyncpa [#allocation3], 1 }
 0x376   :  { %512 = vsyncpa [#allocation6], 1 }
 0x377   :  { %513 = vsyncpa [#allocation9], 1 }
 0x378   :  { %514 = vsyncpa [#allocation4], 1 }

</bundles_post_ra>
